<compile_context>
chip_gen: v5e
topology: v5e:2x2
jax: 0.10.0
libtpu: 0.0.40
codegen_flags: <defaults>
</compile_context>

<pallas_src>
import functools

import jax
import jax.numpy as jnp
from jax import lax
from jax.experimental import pallas as pl
from jax.experimental.pallas import tpu as pltpu


def _round_up(x, m):
    return (x + m - 1) // m * m


# ---------------------------------------------------------------------------
# Kernel 1/3: tiled linear (y = x @ w + b), bf16 MXU inputs, f32 accumulate.
# ---------------------------------------------------------------------------
def linear_bias_kernel(x_ref, w_ref, b_ref, o_ref):
    acc = jnp.dot(x_ref[...], w_ref[...], preferred_element_type=jnp.float32)
    o_ref[...] = (acc + b_ref[...]).astype(o_ref.dtype)


def linear_pallas(x, w, b, out_dtype=jnp.float32):
    """x: (M, K); w: (K, Nout); b: (Nout,).  Returns (M, Nout) in out_dtype."""
    M, K = x.shape
    Nout = w.shape[1]
    TM = 128 if M >= 128 else _round_up(M, 8)
    Mp = _round_up(M, TM)
    Np = _round_up(Nout, 128)          # lane-dense output (multiple of 128)

    xb = x.astype(jnp.bfloat16)
    wb = w.astype(jnp.bfloat16)
    bb = b.astype(jnp.float32)
    if Mp != M:
        xb = jnp.pad(xb, ((0, Mp - M), (0, 0)))
    if Np != Nout:
        wb = jnp.pad(wb, ((0, 0), (0, Np - Nout)))
        bb = jnp.pad(bb, (0, Np - Nout))
    bb = bb.reshape(1, Np)

    out = pl.pallas_call(
        linear_bias_kernel,
        out_shape=jax.ShapeDtypeStruct((Mp, Np), out_dtype),
        grid=(Mp // TM,),
        in_specs=[
            pl.BlockSpec((TM, K), lambda i: (i, 0)),    # streamed activations
            pl.BlockSpec((K, Np), lambda i: (0, 0)),    # resident weight
            pl.BlockSpec((1, Np), lambda i: (0, 0)),    # resident bias
        ],
        out_specs=pl.BlockSpec((TM, Np), lambda i: (i, 0)),
        compiler_params=pltpu.CompilerParams(dimension_semantics=("parallel",)),
        cost_estimate=pl.CostEstimate(
            flops=2 * Mp * K * Np,
            transcendentals=0,
            bytes_accessed=Mp * K * 2 + K * Np * 2 + Np * 4
            + Mp * Np * jnp.dtype(out_dtype).itemsize),
    )(xb, wb, bb)
    return out[:M, :Nout]


# ---------------------------------------------------------------------------
# Kernel 2: per-batch attention + re-attention transform + attn @ v.
# ---------------------------------------------------------------------------
def reattention_kernel(qkv_ref, wmix_ref, shift_ref, attn_ref, ctx_ref, *,
                       num_heads, head_dim, dim, scale):
    # qkv_ref : (1, N, 3C) bf16  — columns [0:C)=q, [C:2C)=k, [2C:3C)=v
    # wmix_ref: (H, H)  f32 SMEM — folded conv1x1 * BN-scale * reatten_scale
    # shift_ref: (H,)   f32 SMEM — folded conv-bias/BN-shift * reatten_scale
    # attn_ref: (1, H, N, N) f32 out (attn_next)
    # ctx_ref : (1, N, C)    bf16 out (attn @ v, already in (N, C) layout)
    H, D, C = num_heads, head_dim, dim

    # Per-input-head softmax(q k^T * scale).
    attn = []
    for h in range(H):
        q = qkv_ref[0, :, h * D:(h + 1) * D]
        k = qkv_ref[0, :, C + h * D:C + (h + 1) * D]
        s = lax.dot_general(q, k, (((1,), (1,)), ((), ())),
                            preferred_element_type=jnp.float32) * scale
        m = jnp.max(s, axis=-1, keepdims=True)
        p = jnp.exp(s - m)
        l = jnp.sum(p, axis=-1, keepdims=True)
        attn.append(p * pl.reciprocal(l, approx=True))

    # Re-attention: each output head is an affine mix over input heads
    # (1x1 conv + eval BatchNorm + reatten_scale folded into wmix/shift).
    for o in range(H):
        row = attn[0] * wmix_ref[o, 0]
        for h in range(1, H):
            row = row + attn[h] * wmix_ref[o, h]
        row = row + shift_ref[o]
        attn_ref[0, o] = row.astype(attn_ref.dtype)
        v = qkv_ref[0, :, 2 * C + o * D:2 * C + (o + 1) * D]
        ctx_ref[0, :, o * D:(o + 1) * D] = jnp.dot(
            row.astype(qkv_ref.dtype), v,
            preferred_element_type=jnp.float32).astype(ctx_ref.dtype)


# ---------------------------------------------------------------------------
# Forward wrapper (matches ReAttention.forward with apply_transform handling).
# ---------------------------------------------------------------------------
def reattention_forward(x, *, w_qkv, b_qkv, w_proj, b_proj, w_re, b_re,
                        bn_gamma, bn_beta, bn_mean, bn_var, num_heads,
                        qk_scale=None, apply_transform=True,
                        transform_scale=False, bn_eps=1e-5):
    B, N, C = x.shape
    H = num_heads
    D = C // H
    scale = qk_scale if qk_scale is not None else D ** (-0.5)
    reatten_scale = scale if transform_scale else 1.0

    if b_qkv is None:
        b_qkv = jnp.zeros((w_qkv.shape[0],), jnp.float32)

    # 1) qkv projection (PyTorch Linear weight is (out, in) -> transpose).
    qkv = linear_pallas(x.reshape(B * N, C), w_qkv.T, b_qkv,
                        out_dtype=jnp.bfloat16)
    qkv = qkv.reshape(B, N, 3 * C)

    # 2) fold conv1x1 + BatchNorm(eval) + reatten_scale into per-head affine.
    if apply_transform:
        inv_std = bn_gamma / jnp.sqrt(bn_var + bn_eps)            # (H,)
        w_eff = (w_re * (inv_std * reatten_scale)[:, None])       # (H, H)
        shift = ((b_re - bn_mean) * inv_std + bn_beta) * reatten_scale
    else:
        w_eff = jnp.eye(H, dtype=jnp.float32)
        shift = jnp.zeros((H,), jnp.float32)
    w_eff = w_eff.astype(jnp.float32)
    shift = shift.astype(jnp.float32)

    kernel = functools.partial(reattention_kernel, num_heads=H, head_dim=D,
                               dim=C, scale=scale)
    attn_next, ctx = pl.pallas_call(
        kernel,
        out_shape=(jax.ShapeDtypeStruct((B, H, N, N), jnp.float32),
                   jax.ShapeDtypeStruct((B, N, C), jnp.bfloat16)),
        grid=(B,),
        in_specs=[
            pl.BlockSpec((1, N, 3 * C), lambda b: (b, 0, 0)),
            pl.BlockSpec(memory_space=pltpu.MemorySpace.SMEM),
            pl.BlockSpec(memory_space=pltpu.MemorySpace.SMEM),
        ],
        out_specs=(
            pl.BlockSpec((1, H, N, N), lambda b: (b, 0, 0, 0)),
            pl.BlockSpec((1, N, C), lambda b: (b, 0, 0)),
        ),
        compiler_params=pltpu.CompilerParams(dimension_semantics=("parallel",)),
        cost_estimate=pl.CostEstimate(
            flops=B * (4 * H * N * N * D + 2 * H * H * N * N),
            transcendentals=B * H * N * N,
            bytes_accessed=B * N * 3 * C * 2 + B * H * N * N * 4
            + B * N * C * 2 + H * H * 4 + H * 4),
    )(qkv, w_eff, shift)

    # 3) output projection. Dropouts (p=0.0) are identity.
    out = linear_pallas(ctx.reshape(B * N, C), w_proj.T, b_proj,
                        out_dtype=jnp.float32)
    return out.reshape(B, N, C), attn_next


# ---------------------------------------------------------------------------
# Plain-JAX f32 reference (mirrors the PyTorch module, eval mode).
# ---------------------------------------------------------------------------
def reattention_reference(x, *, w_qkv, b_qkv, w_proj, b_proj, w_re, b_re,
                          bn_gamma, bn_beta, bn_mean, bn_var, num_heads,
                          qk_scale=None, apply_transform=True,
                          transform_scale=False, bn_eps=1e-5):
    B, N, C = x.shape
    H = num_heads
    D = C // H
    scale = qk_scale if qk_scale is not None else D ** (-0.5)
    reatten_scale = scale if transform_scale else 1.0
    if b_qkv is None:
        b_qkv = jnp.zeros((w_qkv.shape[0],), jnp.float32)
    qkv = x @ w_qkv.T + b_qkv
    qkv = qkv.reshape(B, N, 3, H, D).transpose(2, 0, 3, 1, 4)
    q, k, v = qkv[0], qkv[1], qkv[2]
    attn = jnp.einsum("bhqd,bhkd->bhqk", q, k) * scale
    attn = jax.nn.softmax(attn, axis=-1)
    if apply_transform:
        attn = jnp.einsum("oh,bhqk->boqk", w_re, attn) + b_re[None, :, None, None]
        attn = (attn - bn_mean[None, :, None, None]) * (
            1.0 / jnp.sqrt(bn_var[None, :, None, None] + bn_eps))
        attn = attn * bn_gamma[None, :, None, None] + bn_beta[None, :, None, None]
        attn = attn * reatten_scale
    attn_next = attn
    xo = jnp.einsum("bhqk,bhkd->bhqd", attn, v)
    xo = xo.transpose(0, 2, 1, 3).reshape(B, N, C)
    xo = xo @ w_proj.T + b_proj
    return xo, attn_next


if __name__ == "__main__":
    # Small shapes consistent with the module: batch=2, seq=8, dim=32, heads=8.
    B, N, C = 2, 8, 32
    H = 8

    key = jax.random.PRNGKey(0)
    ks = jax.random.split(key, 10)
    x = jax.random.normal(ks[0], (B, N, C), jnp.float32)
    w_qkv = jax.random.normal(ks[1], (3 * C, C), jnp.float32) * 0.1   # (out, in)
    w_proj = jax.random.normal(ks[2], (C, C), jnp.float32) * 0.1
    b_proj = jax.random.normal(ks[3], (C,), jnp.float32) * 0.1
    w_re = jax.random.normal(ks[4], (H, H), jnp.float32) * 0.1        # conv1x1
    b_re = jax.random.normal(ks[5], (H,), jnp.float32) * 0.1
    bn_gamma = 1.0 + 0.1 * jax.random.normal(ks[6], (H,), jnp.float32)
    bn_beta = 0.1 * jax.random.normal(ks[7], (H,), jnp.float32)
    bn_mean = 0.1 * jax.random.normal(ks[8], (H,), jnp.float32)
    bn_var = jax.random.uniform(ks[9], (H,), jnp.float32, 0.5, 1.5)

    params = dict(w_qkv=w_qkv, b_qkv=None, w_proj=w_proj, b_proj=b_proj,
                  w_re=w_re, b_re=b_re, bn_gamma=bn_gamma, bn_beta=bn_beta,
                  bn_mean=bn_mean, bn_var=bn_var, num_heads=H,
                  qk_scale=None, apply_transform=True, transform_scale=False)

    out, attn_next = reattention_forward(x, **params)
    out = jax.block_until_ready(out)
    attn_next = jax.block_until_ready(attn_next)

    ref_out, ref_attn = reattention_reference(x, **params)

    assert out.shape == (B, N, C)
    assert attn_next.shape == (B, H, N, N)
    # Kernels use bf16 MXU inputs with f32 accumulation -> loosened tolerance.
    assert jnp.allclose(out, ref_out, atol=2e-2, rtol=2e-2)
    assert jnp.allclose(attn_next, ref_attn, atol=2e-2, rtol=2e-2)

    print("KERNEL_OK")
</pallas_src>

<mosaic_0001>
module attributes {stable_mosaic.version = 11 : i64} {
  func.func @linear_bias_kernel(%arg0: i32, %arg1: memref<16x32xbf16, #tpu.memory_space<vmem>>, %arg2: memref<32x128xbf16, #tpu.memory_space<vmem>>, %arg3: memref<1x128xf32, #tpu.memory_space<vmem>>, %arg4: memref<16x128xbf16, #tpu.memory_space<vmem>>) attributes {dimension_semantics = [#tpu.dimension_semantics<parallel>], iteration_bounds = array<i64: 1>, scalar_prefetch = 0 : i64, scratch_operands = 0 : i64, tpu.core_type = #tpu.core_type<tc>, window_params = [{transform_indices = @transform_0, window_bounds = array<i64: 16, 32>}, {pipeline_mode = #tpu.pipeline_mode<synchronous>, transform_indices = @transform_1, window_bounds = array<i64: 32, 128>}, {pipeline_mode = #tpu.pipeline_mode<synchronous>, transform_indices = @transform_2, window_bounds = array<i64: 1, 128>}, {transform_indices = @transform_3, window_bounds = array<i64: 16, 128>}]} {
    %c0 = arith.constant 0 : index
    %c0_0 = arith.constant 0 : index
    %0 = vector.load %arg1[%c0, %c0_0] : memref<16x32xbf16, #tpu.memory_space<vmem>>, vector<16x32xbf16>
    %c0_1 = arith.constant 0 : index
    %c0_2 = arith.constant 0 : index
    %1 = vector.load %arg2[%c0_1, %c0_2] : memref<32x128xbf16, #tpu.memory_space<vmem>>, vector<32x128xbf16>
    %cst = arith.constant dense<0.000000e+00> : vector<16x128xf32>
    %2 = tpu.matmul %0, %1, %cst {dimension_numbers = #tpu.dot_dimension_numbers<[1], [0], [0], [1], [0, 0, 1, 1], [], []>} : vector<16x32xbf16>, vector<32x128xbf16>, vector<16x128xf32> -> vector<16x128xf32>
    %c0_3 = arith.constant 0 : index
    %c0_4 = arith.constant 0 : index
    %3 = vector.load %arg3[%c0_3, %c0_4] : memref<1x128xf32, #tpu.memory_space<vmem>>, vector<1x128xf32>
    %4 = vector.broadcast %3 : vector<1x128xf32> to vector<16x128xf32>
    %5 = arith.addf %2, %4 : vector<16x128xf32>
    %6 = arith.truncf %5 : vector<16x128xf32> to vector<16x128xbf16>
    %c0_5 = arith.constant 0 : index
    %c0_6 = arith.constant 0 : index
    %7 = vector.load %arg4[%c0_5, %c0_6] : memref<16x128xbf16, #tpu.memory_space<vmem>>, vector<16x128xbf16>
    tpu.vector_store %arg4[%c0_5, %c0_6], %6 {strides = array<i32>} : memref<16x128xbf16, #tpu.memory_space<vmem>>, vector<16x128xbf16>,
    return
  }
  func.func @transform_0(%arg0: i32) -> (i32, i32) {
    %c0_i32 = arith.constant 0 : i32
    %c0_i32_0 = arith.constant 0 : i32
    return %arg0, %c0_i32 : i32, i32
  }
  func.func @transform_1(%arg0: i32) -> (i32, i32) {
    %c0_i32 = arith.constant 0 : i32
    %c0_i32_0 = arith.constant 0 : i32
    %c0_i32_1 = arith.constant 0 : i32
    return %c0_i32, %c0_i32_0 : i32, i32
  }
  func.func @transform_2(%arg0: i32) -> (i32, i32) {
    %c0_i32 = arith.constant 0 : i32
    %c0_i32_0 = arith.constant 0 : i32
    %c0_i32_1 = arith.constant 0 : i32
    return %c0_i32, %c0_i32_0 : i32, i32
  }
  func.func @transform_3(%arg0: i32) -> (i32, i32) {
    %c0_i32 = arith.constant 0 : i32
    %c0_i32_0 = arith.constant 0 : i32
    return %arg0, %c0_i32 : i32, i32
  }
}

</mosaic_0001>

<bundles_post_ra>
// kernel: tpu_custom_call.1
= control target key start
LH: loop header
LB: loop body
LE: loop exit
PB: predicated region body
PF: predicated region fallthrough
CT: control target
= control target key end

     0   :  { %8 = vsyncpa [#allocation3], 0  ;;  %s268_s0 = inlined_call_operand.hbm [shape: bf16[16,32], index: 0, kind: input, shape index: {}]   ;;  %s269_s1 = inlined_call_operand.hbm [shape: bf16[32,128], index: 1, kind: input, shape index: {}]   ;;  %s270_s2 = inlined_call_operand.vmem [shape: f32[1,128], index: 2, kind: input, shape index: {}]   ;;  %s271_s3 = inlined_call_operand.hbm [shape: bf16[16,128], index: 3, kind: output, shape index: {}]  }
   0x1   :  { %9 = vsyncpa [#allocation6], 0 }
   0x2   :  { %10 = vsyncpa [#allocation4], 0  ;;  %s15_s14 = sshll.u32 %s268_s0, 4  ;;  %s222_s15 = smov [#allocation2]   ;;  %s16_s14 = int_to_ptr.hbm [resolvable:$true] %s15_s14 }
   0x3   :  { %s17_s16 = sshll.u32 %s222_s15, 4  ;;  %s28_s19 = sshll.u32 %s269_s1, 4  ;;  %s18_s16 = int_to_ptr.vmem [resolvable:$true] %s17_s16  ;;  %s29_s19 = int_to_ptr.hbm [resolvable:$true] %s28_s19 }
   0x4   :  { %s223_s20 = smov 64   ;;  %s224_s21 = smov 4  }
   0x5   :  { %23 = dma.hbm_to_vmem [thread:$0]  %s16_s14, 128, %s18_s16, [#allocation3], %s223_s20, %s223_s20, %s224_s21  }
   0x6   :  { %s225_s22 = smov [#allocation5]  }
   0x7   :  { %s30_s23 = sshll.u32 %s225_s22, 4  ;;  %s31_s23 = int_to_ptr.vmem [resolvable:$true] %s30_s23 }
   0x8   :  { %36 = dma.hbm_to_vmem [thread:$0]  %s29_s19, 256, %s31_s23, [#allocation6], %s223_s20, %s223_s20, %s224_s21  }
   0x9   :  { %216 = dma.done.wait [#allocation3], 128  }
   0xa   :  { %217 = vsyncadd [#allocation3], 4294967168 }
   0xb   :  { %218 = dma.done.wait [#allocation6], 256  }
   0xc   :  { %219 = vsyncadd [#allocation6], 4294967040  ;;  %v132_v0 = vld [vmem:[#allocation5 + $0x8] sm:$0xff]  ;;  %v131_v1 = vld [vmem:[#allocation5] sm:$0xff]  ;;  %vm75_vm0 = vcmask 261120   ;;  %s226_s24 = smov [#allocation7]  }
   0xd   :  { %85 = vmatpush.bf16.msra.mxu0 %v132_v0  ;;  %v130_v2 = vld [vmem:[#allocation2] sm:$0xff]  ;;  %s101_s25 = sshll.u32 %s226_s24, 4  ;;  %s103_s28 = sshll.u32 %s271_s3, 4  ;;  %s102_s25 = int_to_ptr.vmem [resolvable:$true] %s101_s25  ;;  %s104_s28 = int_to_ptr.hbm [resolvable:$true] %s103_s28 }
   0xe   :  { %v143_v4 = vld [vmem:[%s270_s2] ss:$0 sm:$0xff] }
  0x11   :  { %86 = vmatpush.bf16.msra.mxu0 %v131_v1 }
  0x14   :  { %129 = vmatmul.msk.bf16.vlgmr.msra.gmra.mxu0 %vm75_vm0, %v130_v2 }
  0x91   :  { %v88_v3 = vpop.f32.mrf.mxu0 }
  0x92   :  { %v89_v6 = vadd.f32 %v143_v4, %v88_v3 }
  0x99   :  { %v90_v5 = vpop.f32.mrf.mxu0 }
  0x9a   :  { %v91_v7 = vadd.f32 %v143_v4, %v90_v5 }
  0x9c   :  { %v136_v8 = vpack.c.bf16 %v91_v7, %v89_v6 }
  0x9e   :  { %137 = vst [vmem:[#allocation7] sm:$0xff] %v136_v8  }
  0x9f   :  { %109 = dma.vmem_to_hbm [thread:$0]  %s102_s25, 128, %s104_s28, [#allocation4], %s223_s20, %s223_s20, %s224_s21  }
  0xa0   :  { %220 = dma.done.wait [#allocation4], 128  }
  0xa1   :  { %221 = vsyncadd [#allocation4], 4294967168 }
  0xa2   :  { %114 = vsyncpa [#allocation3], 1 }
  0xa3   :  { %115 = vsyncpa [#allocation6], 1 }
  0xa4   :  { %116 = vsyncpa [#allocation4], 1 }

</bundles_post_ra>
